<compile_context>
chip_gen: v7x
topology: tpu7x:2x2x1
jax: 0.10.0
libtpu: 0.0.40
codegen_flags: <defaults>
</compile_context>

<pallas_src>
import jax
import jax.numpy as jnp
from jax.experimental import pallas as pl
from jax.experimental.pallas import tpu as pltpu


def _bienc_kernel(xf_ref, xb_ref, wih_f_ref, wih_b_ref, bf_ref, bb_ref,
                  whh_ref, wm_top_ref, wm_bot_ref, bm_ref,
                  out_ref, uf_scr, ub_scr, h2_scr, c_scr):
    C = uf_scr.shape[0]            # timesteps in this chunk (static)
    B = out_ref.shape[0]
    H = out_ref.shape[1]
    mxu_dt = whh_ref.dtype         # bfloat16 MXU operand dtype

    ci = pl.program_id(0)
    nc = pl.num_programs(0)

    # zero initial hidden/cell state (PyTorch default) on the first chunk.
    # The off-diagonal blocks of h2_scr are only ever written here.
    @pl.when(ci == 0)
    def _init():
        h2_scr[...] = jnp.zeros_like(h2_scr)
        c_scr[...] = jnp.zeros_like(c_scr)

    # ---- hoisted input projection for this chunk: one (C*B, D) x (D, 4H)
    #      bf16 MXU matmul per direction instead of one per timestep ----
    uf = jnp.dot(xf_ref[...], wih_f_ref[...],
                 preferred_element_type=jnp.float32) + bf_ref[...]   # (C*B, 4H)
    ub = jnp.dot(xb_ref[...], wih_b_ref[...],
                 preferred_element_type=jnp.float32) + bb_ref[...]   # (C*B, 4H)

    # Two contiguous bulk stores (no per-timestep scatter).  xb holds the
    # matching *tail* chunk of x in forward time order; the backward direction
    # consumes ub_scr back-to-front (index C-1-s) inside the step loop.
    uf_scr[...] = uf.reshape(C, B, 4 * H)
    ub_scr[...] = ub.reshape(C, B, 4 * H)

    whh = whh_ref[...]             # (2H, 4H) bf16, hoisted out of the loop

    if H % 128 != 0:
        # fallback lane mask for the tanh ("g") gate when slices are not
        # vreg-lane aligned (small H); hoisted out of the step loop.
        col4 = jax.lax.broadcasted_iota(jnp.int32, (2 * B, 4 * H), 1)
        g_lane = (col4 >= 2 * H) & (col4 < 3 * H)

    def step(s, carry):
        # fwd rows use this chunk's time s; bwd rows the reversed index C-1-s.
        u_t = jnp.concatenate([uf_scr[s], ub_scr[C - 1 - s]], axis=0)  # (2B,4H)
        # single recurrent matmul serves both directions (block-diagonal lhs)
        gates = jnp.dot(h2_scr[...].astype(mxu_dt), whh,
                        preferred_element_type=jnp.float32) + u_t
        if H % 128 == 0:
            # 4H lanes of EUP work (instead of 8H + a select)
            sig_if = jax.nn.sigmoid(gates[:, 0:2 * H])
            i_g = sig_if[:, 0:H]
            f_g = sig_if[:, H:2 * H]
            g_g = jnp.tanh(gates[:, 2 * H:3 * H])
            o_g = jax.nn.sigmoid(gates[:, 3 * H:4 * H])
        else:
            act = jnp.where(g_lane, jnp.tanh(gates), jax.nn.sigmoid(gates))
            i_g = act[:, 0 * H:1 * H]
            f_g = act[:, 1 * H:2 * H]
            g_g = act[:, 2 * H:3 * H]
            o_g = act[:, 3 * H:4 * H]
        c_new = f_g * c_scr[...] + i_g * g_g
        h_new = o_g * jnp.tanh(c_new)
        c_scr[...] = c_new
        # write only the two live diagonal blocks of the block-diagonal state;
        # off-diagonal zeros were initialized once and are never touched.
        h2_scr[0:B, 0:H] = h_new[0:B, :]
        h2_scr[B:2 * B, H:2 * H] = h_new[B:2 * B, :]
        return carry

    jax.lax.fori_loop(0, C, step, 0, unroll=min(4, C))

    # ---- gated merge of the final hidden states (last chunk only) ----
    @pl.when(ci == nc - 1)
    def _merge():
        hf = h2_scr[0:B, 0:H]          # forward final hidden (f32)
        hb = h2_scr[B:2 * B, H:2 * H]  # backward final hidden
        # fused [gate | transform] pre-activations; no (B, 2H) concat needed
        pre = (jnp.dot(hf.astype(mxu_dt), wm_top_ref[...],
                       preferred_element_type=jnp.float32)
               + jnp.dot(hb.astype(mxu_dt), wm_bot_ref[...],
                         preferred_element_type=jnp.float32)
               + bm_ref[...])
        gate = jax.nn.sigmoid(pre[:, 0:H])
        transform = jnp.tanh(pre[:, H:2 * H])
        out_ref[...] = gate * transform + (1.0 - gate) * hf


def _vmem_budget_bytes():
    """~96 MiB on 128 MiB parts (v5e/v6e), ~48 MiB on v7x (64 MiB / TC)."""
    cap = 64 * 1024 * 1024
    try:
        cap = int(getattr(pltpu.get_tpu_info(), "vmem_capacity_bytes", cap)) or cap
    except Exception:
        pass
    return int(min(cap * 3 // 4, 100 * 1024 * 1024))


def _estimate_vmem(B, chunk, D, H):
    cb = chunk * B
    x_stream = 2 * 2 * cb * D * 2                 # two streams x double buffer, bf16
    u_scratch = 2 * chunk * B * 4 * H * 4         # fwd + bwd projections, f32
    weights = 2 * 2 * (2 * D * 4 * H + 2 * H * 4 * H + 2 * H * 2 * H)  # bf16 x dbl-buf
    biases = 2 * 4 * (2 * 4 * H + 2 * H)
    state = 4 * (2 * B * 2 * H + 2 * B * H) + 4 * B * H
    return x_stream + u_scratch + weights + biases + state + (1 << 20)  # + slack


def _pick_chunk(B, T, D, H, budget):
    cands = [c for c in range(1, T + 1)
             if T % c == 0 and (T // c == 1 or (c * B) % 8 == 0)]
    fitting = [c for c in cands if _estimate_vmem(B, c, D, H) <= budget]
    return max(fitting) if fitting else min(cands)


def bidirectional_encoder(x, params, *, chunk=None, vmem_limit_bytes=None):
    """x: (B, T, D) batch-first float32.  Returns (1, B, H) like PyTorch."""
    B, T, D = x.shape
    H = params["b_gate"].shape[-1]

    if vmem_limit_bytes is None:
        vmem_limit_bytes = _vmem_budget_bytes()
    if chunk is None:
        chunk = _pick_chunk(B, T, D, H, int(vmem_limit_bytes * 0.8))
    assert T % chunk == 0, "chunk must divide T"
    n_chunks = T // chunk
    assert n_chunks == 1 or (chunk * B) % 8 == 0, \
        "streamed chunks need chunk*B to be a multiple of 8"

    mxu_dt = jnp.bfloat16

    # time-major flatten fused with the bf16 cast: a single extra HBM pass that
    # writes half the bytes and halves the kernel's 2x streaming DMA traffic.
    x_flat = jnp.transpose(x, (1, 0, 2)).reshape(T * B, D).astype(mxu_dt)

    wih_f = params["wih_f"].astype(mxu_dt)                          # (D, 4H)
    wih_b = params["wih_b"].astype(mxu_dt)
    # stacked recurrent weights for the block-diagonal (2B, 2H) state layout
    whh_cat = jnp.concatenate([params["whh_f"], params["whh_b"]],
                              axis=0).astype(mxu_dt)                # (2H, 4H)
    b_f = params["b_f"]                                             # (1, 4H) f32
    b_b = params["b_b"]
    # gated-merge weights: split into hf/hb halves, fuse [gate | transform]
    wg, wt = params["w_gate"], params["w_trans"]                    # (2H, H)
    wm_top = jnp.concatenate([wg[:H], wt[:H]], axis=1).astype(mxu_dt)   # (H, 2H)
    wm_bot = jnp.concatenate([wg[H:], wt[H:]], axis=1).astype(mxu_dt)   # (H, 2H)
    b_m = jnp.concatenate([params["b_gate"], params["b_trans"]], axis=1)  # (1,2H)

    cb = chunk * B

    def full2d(r, c):
        return pl.BlockSpec((r, c), lambda i: (0, 0))

    grid_spec = pltpu.PrefetchScalarGridSpec(
        num_scalar_prefetch=0,
        grid=(n_chunks,),
        in_specs=[
            # forward stream reads chunk i; backward stream reads the matching
            # tail chunk (n_chunks-1-i) of the SAME array (no flipped copy).
            pl.BlockSpec((cb, D), lambda i: (i, 0)),
            pl.BlockSpec((cb, D), lambda i, n=n_chunks: (n - 1 - i, 0)),
            full2d(D, 4 * H),          # wih_f
            full2d(D, 4 * H),          # wih_b
            full2d(1, 4 * H),          # b_f
            full2d(1, 4 * H),          # b_b
            full2d(2 * H, 4 * H),      # whh_cat
            full2d(H, 2 * H),          # wm_top
            full2d(H, 2 * H),          # wm_bot
            full2d(1, 2 * H),          # b_m
        ],
        out_specs=pl.BlockSpec((B, H), lambda i: (0, 0)),
        scratch_shapes=[
            pltpu.VMEM((chunk, B, 4 * H), jnp.float32),  # fwd input projection
            pltpu.VMEM((chunk, B, 4 * H), jnp.float32),  # bwd input projection
            pltpu.VMEM((2 * B, 2 * H), jnp.float32),     # h (block-diagonal)
            pltpu.VMEM((2 * B, H), jnp.float32),         # c
        ],
    )

    out = pl.pallas_call(
        _bienc_kernel,
        out_shape=jax.ShapeDtypeStruct((B, H), jnp.float32),
        grid_spec=grid_spec,
        compiler_params=pltpu.CompilerParams(
            dimension_semantics=("arbitrary",),   # sequential carry over time
            vmem_limit_bytes=int(vmem_limit_bytes),
        ),
    )(x_flat, x_flat, wih_f, wih_b, b_f, b_b, whh_cat, wm_top, wm_bot, b_m)

    # num_layers == 1 -> hidden state shape (1, B, H), matching PyTorch
    return out[None, :, :]


def init_params(key, input_dim, output_dim, num_layers=1):
    # TODO(synk): only num_layers=1 (the module default) is implemented.
    assert num_layers == 1
    D, H = input_dim, output_dim
    k = 1.0 / jnp.sqrt(jnp.float32(H))

    keys = jax.random.split(key, 12)

    def u(kk, shape):
        return jax.random.uniform(kk, shape, jnp.float32, minval=-k, maxval=k)

    # LSTM weights stored pre-transposed for `x @ W` (PyTorch gate order
    # [i|f|g|o]); biases combined (bias_ih + bias_hh) into one row vector.
    return {
        "wih_f": u(keys[0], (D, 4 * H)),
        "whh_f": u(keys[1], (H, 4 * H)),
        "b_f": u(keys[2], (1, 4 * H)) + u(keys[3], (1, 4 * H)),
        "wih_b": u(keys[4], (D, 4 * H)),
        "whh_b": u(keys[5], (H, 4 * H)),
        "b_b": u(keys[6], (1, 4 * H)) + u(keys[7], (1, 4 * H)),
        "w_gate": u(keys[8], (2 * H, H)),
        "b_gate": u(keys[9], (1, H)),
        "w_trans": u(keys[10], (2 * H, H)),
        "b_trans": u(keys[11], (1, H)),
    }


def _reference(x, params, mxu_dtype=jnp.float32):
    """Pure-JAX reference of the PyTorch forward pass.  `mxu_dtype` mirrors the
    kernel's matmul-operand precision (bf16 operands, f32 accumulation)."""
    H = params["b_gate"].shape[-1]
    cast = lambda a: a.astype(mxu_dtype)

    def run_lstm(seq, wih, whh, b):
        Bb = seq.shape[0]
        h0 = jnp.zeros((Bb, H), jnp.float32)
        c0 = jnp.zeros((Bb, H), jnp.float32)
        wih_c, whh_c = cast(wih), cast(whh)

        def cell(carry, x_t):
            h, c = carry
            gates = (jnp.dot(cast(x_t), wih_c, preferred_element_type=jnp.float32)
                     + jnp.dot(cast(h), whh_c, preferred_element_type=jnp.float32)
                     + b)
            i = jax.nn.sigmoid(gates[:, 0 * H:1 * H])
            f = jax.nn.sigmoid(gates[:, 1 * H:2 * H])
            g = jnp.tanh(gates[:, 2 * H:3 * H])
            o = jax.nn.sigmoid(gates[:, 3 * H:4 * H])
            c_new = f * c + i * g
            h_new = o * jnp.tanh(c_new)
            return (h_new, c_new), None

        (hT, _), _ = jax.lax.scan(cell, (h0, c0), jnp.transpose(seq, (1, 0, 2)))
        return hT

    hf = run_lstm(x, params["wih_f"], params["whh_f"], params["b_f"])
    hb = run_lstm(x[:, ::-1, :], params["wih_b"], params["whh_b"], params["b_b"])
    xcat = jnp.concatenate([hf, hb], axis=-1)
    gate = jax.nn.sigmoid(
        jnp.dot(cast(xcat), cast(params["w_gate"]),
                preferred_element_type=jnp.float32) + params["b_gate"])
    transform = jnp.tanh(
        jnp.dot(cast(xcat), cast(params["w_trans"]),
                preferred_element_type=jnp.float32) + params["b_trans"])
    return (gate * transform + (1.0 - gate) * hf)[None, :, :]


if __name__ == "__main__":
    B, T, D, H = 8, 8, 16, 32

    key = jax.random.PRNGKey(0)
    k_x, k_p = jax.random.split(key)
    x = jax.random.normal(k_x, (B, T, D), jnp.float32)
    params = init_params(k_p, D, H, num_layers=1)

    # chunk=4 -> grid of 2 time-chunks, exercising the streamed / carried path
    out = jax.block_until_ready(bidirectional_encoder(x, params, chunk=4))
    # auto-derived chunk (single-chunk path at this size)
    out_auto = jax.block_until_ready(bidirectional_encoder(x, params))

    ref_bf16 = jax.block_until_ready(_reference(x, params, jnp.bfloat16))
    ref_f32 = jax.block_until_ready(_reference(x, params, jnp.float32))

    assert out.shape == (1, B, H), out.shape
    # strict check vs. a reference using the same bf16-operand matmul policy
    err = float(jnp.max(jnp.abs(out - ref_bf16)))
    assert err < 2e-3, err
    err_auto = float(jnp.max(jnp.abs(out_auto - ref_bf16)))
    assert err_auto < 2e-3, err_auto
    # sanity check vs. the exact f32 semantics of the PyTorch module
    err32 = float(jnp.max(jnp.abs(out - ref_f32)))
    assert err32 < 1e-1, err32

    print("KERNEL_OK")
</pallas_src>

<mosaic_0001>
module attributes {stable_mosaic.version = 11 : i64} {
  func.func @_bienc_kernel(%arg0: i32, %arg1: memref<32x16xbf16, #tpu.memory_space<vmem>>, %arg2: memref<32x16xbf16, #tpu.memory_space<vmem>>, %arg3: memref<16x128xbf16, #tpu.memory_space<vmem>>, %arg4: memref<16x128xbf16, #tpu.memory_space<vmem>>, %arg5: memref<1x128xf32, #tpu.memory_space<vmem>>, %arg6: memref<1x128xf32, #tpu.memory_space<vmem>>, %arg7: memref<64x128xbf16, #tpu.memory_space<vmem>>, %arg8: memref<32x64xbf16, #tpu.memory_space<vmem>>, %arg9: memref<32x64xbf16, #tpu.memory_space<vmem>>, %arg10: memref<1x64xf32, #tpu.memory_space<vmem>>, %arg11: memref<8x32xf32, #tpu.memory_space<vmem>>, %arg12: memref<4x8x128xf32, #tpu.memory_space<vmem>>, %arg13: memref<4x8x128xf32, #tpu.memory_space<vmem>>, %arg14: memref<16x64xf32, #tpu.memory_space<vmem>>, %arg15: memref<16x32xf32, #tpu.memory_space<vmem>>) attributes {dimension_semantics = [#tpu.dimension_semantics<arbitrary>], iteration_bounds = array<i64: 2>, scalar_prefetch = 0 : i64, scratch_operands = 4 : i64, tpu.core_type = #tpu.core_type<tc>, window_params = [{transform_indices = @transform_0, window_bounds = array<i64: 32, 16>}, {transform_indices = @transform_1, window_bounds = array<i64: 32, 16>}, {pipeline_mode = #tpu.pipeline_mode<synchronous>, transform_indices = @transform_2, window_bounds = array<i64: 16, 128>}, {pipeline_mode = #tpu.pipeline_mode<synchronous>, transform_indices = @transform_3, window_bounds = array<i64: 16, 128>}, {pipeline_mode = #tpu.pipeline_mode<synchronous>, transform_indices = @transform_4, window_bounds = array<i64: 1, 128>}, {pipeline_mode = #tpu.pipeline_mode<synchronous>, transform_indices = @transform_5, window_bounds = array<i64: 1, 128>}, {pipeline_mode = #tpu.pipeline_mode<synchronous>, transform_indices = @transform_6, window_bounds = array<i64: 64, 128>}, {pipeline_mode = #tpu.pipeline_mode<synchronous>, transform_indices = @transform_7, window_bounds = array<i64: 32, 64>}, {pipeline_mode = #tpu.pipeline_mode<synchronous>, transform_indices = @transform_8, window_bounds = array<i64: 32, 64>}, {pipeline_mode = #tpu.pipeline_mode<synchronous>, transform_indices = @transform_9, window_bounds = array<i64: 1, 64>}, {pipeline_mode = #tpu.pipeline_mode<synchronous>, transform_indices = @transform_10, window_bounds = array<i64: 8, 32>}]} {
    %c0_i32 = arith.constant 0 : i32
    %0 = arith.cmpi eq, %arg0, %c0_i32 : i32
    %1 = arith.extui %0 : i1 to i32
    %c0_i32_0 = arith.constant 0 : i32
    %2 = arith.cmpi ne, %1, %c0_i32_0 : i32
    scf.if %2 {
      %cst_90 = arith.constant 0.000000e+00 : f32
      %165 = vector.broadcast %cst_90 : f32 to vector<16x64xf32>
      %c0_91 = arith.constant 0 : index
      %c0_92 = arith.constant 0 : index
      %166 = vector.load %arg14[%c0_91, %c0_92] : memref<16x64xf32, #tpu.memory_space<vmem>>, vector<16x64xf32>
      tpu.vector_store %arg14[%c0_91, %c0_92], %165 {strides = array<i32>} : memref<16x64xf32, #tpu.memory_space<vmem>>, vector<16x64xf32>,
      %cst_93 = arith.constant 0.000000e+00 : f32
      %167 = vector.broadcast %cst_93 : f32 to vector<16x32xf32>
      %c0_94 = arith.constant 0 : index
      %c0_95 = arith.constant 0 : index
      %168 = vector.load %arg15[%c0_94, %c0_95] : memref<16x32xf32, #tpu.memory_space<vmem>>, vector<16x32xf32>
      tpu.vector_store %arg15[%c0_94, %c0_95], %167 {strides = array<i32>} : memref<16x32xf32, #tpu.memory_space<vmem>>, vector<16x32xf32>,
    } else {
    }
    %c0 = arith.constant 0 : index
    %c0_1 = arith.constant 0 : index
    %3 = vector.load %arg1[%c0, %c0_1] : memref<32x16xbf16, #tpu.memory_space<vmem>>, vector<32x16xbf16>
    %c0_2 = arith.constant 0 : index
    %c0_3 = arith.constant 0 : index
    %4 = vector.load %arg3[%c0_2, %c0_3] : memref<16x128xbf16, #tpu.memory_space<vmem>>, vector<16x128xbf16>
    %cst = arith.constant dense<0.000000e+00> : vector<32x128xf32>
    %5 = tpu.matmul %3, %4, %cst {dimension_numbers = #tpu.dot_dimension_numbers<[1], [0], [0], [1], [0, 0, 1, 1], [], []>} : vector<32x16xbf16>, vector<16x128xbf16>, vector<32x128xf32> -> vector<32x128xf32>
    %c0_4 = arith.constant 0 : index
    %c0_5 = arith.constant 0 : index
    %6 = vector.load %arg5[%c0_4, %c0_5] : memref<1x128xf32, #tpu.memory_space<vmem>>, vector<1x128xf32>
    %7 = vector.broadcast %6 : vector<1x128xf32> to vector<32x128xf32>
    %8 = arith.addf %5, %7 : vector<32x128xf32>
    %c0_6 = arith.constant 0 : index
    %c0_7 = arith.constant 0 : index
    %9 = vector.load %arg2[%c0_6, %c0_7] : memref<32x16xbf16, #tpu.memory_space<vmem>>, vector<32x16xbf16>
    %c0_8 = arith.constant 0 : index
    %c0_9 = arith.constant 0 : index
    %10 = vector.load %arg4[%c0_8, %c0_9] : memref<16x128xbf16, #tpu.memory_space<vmem>>, vector<16x128xbf16>
    %cst_10 = arith.constant dense<0.000000e+00> : vector<32x128xf32>
    %11 = tpu.matmul %9, %10, %cst_10 {dimension_numbers = #tpu.dot_dimension_numbers<[1], [0], [0], [1], [0, 0, 1, 1], [], []>} : vector<32x16xbf16>, vector<16x128xbf16>, vector<32x128xf32> -> vector<32x128xf32>
    %c0_11 = arith.constant 0 : index
    %c0_12 = arith.constant 0 : index
    %12 = vector.load %arg6[%c0_11, %c0_12] : memref<1x128xf32, #tpu.memory_space<vmem>>, vector<1x128xf32>
    %13 = vector.broadcast %12 : vector<1x128xf32> to vector<32x128xf32>
    %14 = arith.addf %11, %13 : vector<32x128xf32>
    %15 = vector.shape_cast %8 : vector<32x128xf32> to vector<4x8x128xf32>
    %c0_13 = arith.constant 0 : index
    %c0_14 = arith.constant 0 : index
    %c0_15 = arith.constant 0 : index
    %16 = vector.load %arg12[%c0_13, %c0_14, %c0_15] : memref<4x8x128xf32, #tpu.memory_space<vmem>>, vector<4x8x128xf32>
    tpu.vector_store %arg12[%c0_13, %c0_14, %c0_15], %15 {strides = array<i32>} : memref<4x8x128xf32, #tpu.memory_space<vmem>>, vector<4x8x128xf32>,
    %17 = vector.shape_cast %14 : vector<32x128xf32> to vector<4x8x128xf32>
    %c0_16 = arith.constant 0 : index
    %c0_17 = arith.constant 0 : index
    %c0_18 = arith.constant 0 : index
    %18 = vector.load %arg13[%c0_16, %c0_17, %c0_18] : memref<4x8x128xf32, #tpu.memory_space<vmem>>, vector<4x8x128xf32>
    tpu.vector_store %arg13[%c0_16, %c0_17, %c0_18], %17 {strides = array<i32>} : memref<4x8x128xf32, #tpu.memory_space<vmem>>, vector<4x8x128xf32>,
    %c0_19 = arith.constant 0 : index
    %c0_20 = arith.constant 0 : index
    %19 = vector.load %arg7[%c0_19, %c0_20] : memref<64x128xbf16, #tpu.memory_space<vmem>>, vector<64x128xbf16>
    %20 = tpu.iota {dimensions = array<i32: 1>} : vector<16x128xi32>
    %c64_i32 = arith.constant 64 : i32
    %21 = vector.broadcast %c64_i32 : i32 to vector<16x128xi32>
    %22 = arith.cmpi sge, %20, %21 : vector<16x128xi32>
    %c96_i32 = arith.constant 96 : i32
    %23 = vector.broadcast %c96_i32 : i32 to vector<16x128xi32>
    %24 = arith.cmpi slt, %20, %23 : vector<16x128xi32>
    %25 = arith.andi %22, %24 : vector<16x128xi1>
    %c0_i32_21 = arith.constant 0 : i32
    %26 = arith.index_cast %c0_i32_21 : i32 to index
    %c0_22 = arith.constant 0 : index
    %c0_23 = arith.constant 0 : index
    %27 = vector.load %arg12[%26, %c0_22, %c0_23] : memref<4x8x128xf32, #tpu.memory_space<vmem>>, vector<1x8x128xf32>
    %28 = vector.shape_cast %27 : vector<1x8x128xf32> to vector<8x128xf32>
    %c3_i32 = arith.constant 3 : i32
    %29 = arith.subi %c3_i32, %c0_i32_21 : i32
    %30 = arith.index_cast %29 : i32 to index
    %c0_24 = arith.constant 0 : index
    %c0_25 = arith.constant 0 : index
    %31 = vector.load %arg13[%30, %c0_24, %c0_25] : memref<4x8x128xf32, #tpu.memory_space<vmem>>, vector<1x8x128xf32>
    %32 = vector.shape_cast %31 : vector<1x8x128xf32> to vector<8x128xf32>
    %33 = tpu.concatenate %28, %32 in 0 : vector<8x128xf32>, vector<8x128xf32> -> vector<16x128xf32>
    %c0_26 = arith.constant 0 : index
    %c0_27 = arith.constant 0 : index
    %34 = vector.load %arg14[%c0_26, %c0_27] : memref<16x64xf32, #tpu.memory_space<vmem>>, vector<16x64xf32>
    %35 = arith.truncf %34 : vector<16x64xf32> to vector<16x64xbf16>
    %cst_28 = arith.constant dense<0.000000e+00> : vector<16x128xf32>
    %36 = tpu.matmul %35, %19, %cst_28 {dimension_numbers = #tpu.dot_dimension_numbers<[1], [0], [0], [1], [0, 0, 1, 1], [], []>} : vector<16x64xbf16>, vector<64x128xbf16>, vector<16x128xf32> -> vector<16x128xf32>
    %37 = arith.addf %36, %33 : vector<16x128xf32>
    %38 = math.tanh %37 : vector<16x128xf32>
    %39 = arith.negf %37 : vector<16x128xf32>
    %40 = math.exp %39 : vector<16x128xf32>
    %cst_29 = arith.constant 1.000000e+00 : f32
    %41 = vector.broadcast %cst_29 : f32 to vector<16x128xf32>
    %42 = arith.addf %41, %40 : vector<16x128xf32>
    %43 = arith.divf %41, %42 : vector<16x128xf32>
    %44 = arith.select %25, %38, %43 : vector<16x128xi1>, vector<16x128xf32>
    %45 = vector.extract_strided_slice %44 {offsets = [0, 0], sizes = [16, 32], strides = [1, 1]} : vector<16x128xf32> to vector<16x32xf32>
    %46 = vector.extract_strided_slice %44 {offsets = [0, 32], sizes = [16, 32], strides = [1, 1]} : vector<16x128xf32> to vector<16x32xf32>
    %47 = vector.extract_strided_slice %44 {offsets = [0, 64], sizes = [16, 32], strides = [1, 1]} : vector<16x128xf32> to vector<16x32xf32>
    %48 = vector.extract_strided_slice %44 {offsets = [0, 96], sizes = [16, 32], strides = [1, 1]} : vector<16x128xf32> to vector<16x32xf32>
    %c0_30 = arith.constant 0 : index
    %c0_31 = arith.constant 0 : index
    %49 = vector.load %arg15[%c0_30, %c0_31] : memref<16x32xf32, #tpu.memory_space<vmem>>, vector<16x32xf32>
    %50 = arith.mulf %46, %49 : vector<16x32xf32>
    %51 = arith.mulf %45, %47 : vector<16x32xf32>
    %52 = arith.addf %50, %51 : vector<16x32xf32>
    %53 = math.tanh %52 : vector<16x32xf32>
    %54 = arith.mulf %48, %53 : vector<16x32xf32>
    %c0_32 = arith.constant 0 : index
    %c0_33 = arith.constant 0 : index
    %55 = vector.load %arg15[%c0_32, %c0_33] : memref<16x32xf32, #tpu.memory_space<vmem>>, vector<16x32xf32>
    tpu.vector_store %arg15[%c0_32, %c0_33], %52 {strides = array<i32>} : memref<16x32xf32, #tpu.memory_space<vmem>>, vector<16x32xf32>,
    %56 = vector.extract_strided_slice %54 {offsets = [0, 0], sizes = [8, 32], strides = [1, 1]} : vector<16x32xf32> to vector<8x32xf32>
    %c0_34 = arith.constant 0 : index
    %c0_35 = arith.constant 0 : index
    %57 = vector.load %arg14[%c0_34, %c0_35] : memref<16x64xf32, #tpu.memory_space<vmem>>, vector<8x32xf32>
    tpu.vector_store %arg14[%c0_34, %c0_35], %56 {strides = array<i32>} : memref<16x64xf32, #tpu.memory_space<vmem>>, vector<8x32xf32>,
    %58 = vector.extract_strided_slice %54 {offsets = [8, 0], sizes = [8, 32], strides = [1, 1]} : vector<16x32xf32> to vector<8x32xf32>
    %c8 = arith.constant 8 : index
    %c32 = arith.constant 32 : index
    %59 = vector.load %arg14[%c8, %c32] : memref<16x64xf32, #tpu.memory_space<vmem>>, vector<8x32xf32>
    tpu.vector_store %arg14[%c8, %c32], %58 {strides = array<i32>} : memref<16x64xf32, #tpu.memory_space<vmem>>, vector<8x32xf32>,
    %c1_i32 = arith.constant 1 : i32
    %60 = arith.index_cast %c1_i32 : i32 to index
    %c0_36 = arith.constant 0 : index
    %c0_37 = arith.constant 0 : index
    %61 = vector.load %arg12[%60, %c0_36, %c0_37] : memref<4x8x128xf32, #tpu.memory_space<vmem>>, vector<1x8x128xf32>
    %62 = vector.shape_cast %61 : vector<1x8x128xf32> to vector<8x128xf32>
    %c3_i32_38 = arith.constant 3 : i32
    %63 = arith.subi %c3_i32_38, %c1_i32 : i32
    %64 = arith.index_cast %63 : i32 to index
    %c0_39 = arith.constant 0 : index
    %c0_40 = arith.constant 0 : index
    %65 = vector.load %arg13[%64, %c0_39, %c0_40] : memref<4x8x128xf32, #tpu.memory_space<vmem>>, vector<1x8x128xf32>
    %66 = vector.shape_cast %65 : vector<1x8x128xf32> to vector<8x128xf32>
    %67 = tpu.concatenate %62, %66 in 0 : vector<8x128xf32>, vector<8x128xf32> -> vector<16x128xf32>
    %c0_41 = arith.constant 0 : index
    %c0_42 = arith.constant 0 : index
    %68 = vector.load %arg14[%c0_41, %c0_42] : memref<16x64xf32, #tpu.memory_space<vmem>>, vector<16x64xf32>
    %69 = arith.truncf %68 : vector<16x64xf32> to vector<16x64xbf16>
    %cst_43 = arith.constant dense<0.000000e+00> : vector<16x128xf32>
    %70 = tpu.matmul %69, %19, %cst_43 {dimension_numbers = #tpu.dot_dimension_numbers<[1], [0], [0], [1], [0, 0, 1, 1], [], []>} : vector<16x64xbf16>, vector<64x128xbf16>, vector<16x128xf32> -> vector<16x128xf32>
    %71 = arith.addf %70, %67 : vector<16x128xf32>
    %72 = math.tanh %71 : vector<16x128xf32>
    %73 = arith.negf %71 : vector<16x128xf32>
    %74 = math.exp %73 : vector<16x128xf32>
    %cst_44 = arith.constant 1.000000e+00 : f32
    %75 = vector.broadcast %cst_44 : f32 to vector<16x128xf32>
    %76 = arith.addf %75, %74 : vector<16x128xf32>
    %77 = arith.divf %75, %76 : vector<16x128xf32>
    %78 = arith.select %25, %72, %77 : vector<16x128xi1>, vector<16x128xf32>
    %79 = vector.extract_strided_slice %78 {offsets = [0, 0], sizes = [16, 32], strides = [1, 1]} : vector<16x128xf32> to vector<16x32xf32>
    %80 = vector.extract_strided_slice %78 {offsets = [0, 32], sizes = [16, 32], strides = [1, 1]} : vector<16x128xf32> to vector<16x32xf32>
    %81 = vector.extract_strided_slice %78 {offsets = [0, 64], sizes = [16, 32], strides = [1, 1]} : vector<16x128xf32> to vector<16x32xf32>
    %82 = vector.extract_strided_slice %78 {offsets = [0, 96], sizes = [16, 32], strides = [1, 1]} : vector<16x128xf32> to vector<16x32xf32>
    %c0_45 = arith.constant 0 : index
    %c0_46 = arith.constant 0 : index
    %83 = vector.load %arg15[%c0_45, %c0_46] : memref<16x32xf32, #tpu.memory_space<vmem>>, vector<16x32xf32>
    %84 = arith.mulf %80, %83 : vector<16x32xf32>
    %85 = arith.mulf %79, %81 : vector<16x32xf32>
    %86 = arith.addf %84, %85 : vector<16x32xf32>
    %87 = math.tanh %86 : vector<16x32xf32>
    %88 = arith.mulf %82, %87 : vector<16x32xf32>
    %c0_47 = arith.constant 0 : index
    %c0_48 = arith.constant 0 : index
    %89 = vector.load %arg15[%c0_47, %c0_48] : memref<16x32xf32, #tpu.memory_space<vmem>>, vector<16x32xf32>
    tpu.vector_store %arg15[%c0_47, %c0_48], %86 {strides = array<i32>} : memref<16x32xf32, #tpu.memory_space<vmem>>, vector<16x32xf32>,
    %90 = vector.extract_strided_slice %88 {offsets = [0, 0], sizes = [8, 32], strides = [1, 1]} : vector<16x32xf32> to vector<8x32xf32>
    %c0_49 = arith.constant 0 : index
    %c0_50 = arith.constant 0 : index
    %91 = vector.load %arg14[%c0_49, %c0_50] : memref<16x64xf32, #tpu.memory_space<vmem>>, vector<8x32xf32>
    tpu.vector_store %arg14[%c0_49, %c0_50], %90 {strides = array<i32>} : memref<16x64xf32, #tpu.memory_space<vmem>>, vector<8x32xf32>,
    %92 = vector.extract_strided_slice %88 {offsets = [8, 0], sizes = [8, 32], strides = [1, 1]} : vector<16x32xf32> to vector<8x32xf32>
    %c8_51 = arith.constant 8 : index
    %c32_52 = arith.constant 32 : index
    %93 = vector.load %arg14[%c8_51, %c32_52] : memref<16x64xf32, #tpu.memory_space<vmem>>, vector<8x32xf32>
    tpu.vector_store %arg14[%c8_51, %c32_52], %92 {strides = array<i32>} : memref<16x64xf32, #tpu.memory_space<vmem>>, vector<8x32xf32>,
    %c2_i32 = arith.constant 2 : i32
    %94 = arith.index_cast %c2_i32 : i32 to index
    %c0_53 = arith.constant 0 : index
    %c0_54 = arith.constant 0 : index
    %95 = vector.load %arg12[%94, %c0_53, %c0_54] : memref<4x8x128xf32, #tpu.memory_space<vmem>>, vector<1x8x128xf32>
    %96 = vector.shape_cast %95 : vector<1x8x128xf32> to vector<8x128xf32>
    %c3_i32_55 = arith.constant 3 : i32
    %97 = arith.subi %c3_i32_55, %c2_i32 : i32
    %98 = arith.index_cast %97 : i32 to index
    %c0_56 = arith.constant 0 : index
    %c0_57 = arith.constant 0 : index
    %99 = vector.load %arg13[%98, %c0_56, %c0_57] : memref<4x8x128xf32, #tpu.memory_space<vmem>>, vector<1x8x128xf32>
    %100 = vector.shape_cast %99 : vector<1x8x128xf32> to vector<8x128xf32>
    %101 = tpu.concatenate %96, %100 in 0 : vector<8x128xf32>, vector<8x128xf32> -> vector<16x128xf32>
    %c0_58 = arith.constant 0 : index
    %c0_59 = arith.constant 0 : index
    %102 = vector.load %arg14[%c0_58, %c0_59] : memref<16x64xf32, #tpu.memory_space<vmem>>, vector<16x64xf32>
    %103 = arith.truncf %102 : vector<16x64xf32> to vector<16x64xbf16>
    %cst_60 = arith.constant dense<0.000000e+00> : vector<16x128xf32>
    %104 = tpu.matmul %103, %19, %cst_60 {dimension_numbers = #tpu.dot_dimension_numbers<[1], [0], [0], [1], [0, 0, 1, 1], [], []>} : vector<16x64xbf16>, vector<64x128xbf16>, vector<16x128xf32> -> vector<16x128xf32>
    %105 = arith.addf %104, %101 : vector<16x128xf32>
    %106 = math.tanh %105 : vector<16x128xf32>
    %107 = arith.negf %105 : vector<16x128xf32>
    %108 = math.exp %107 : vector<16x128xf32>
    %cst_61 = arith.constant 1.000000e+00 : f32
    %109 = vector.broadcast %cst_61 : f32 to vector<16x128xf32>
    %110 = arith.addf %109, %108 : vector<16x128xf32>
    %111 = arith.divf %109, %110 : vector<16x128xf32>
    %112 = arith.select %25, %106, %111 : vector<16x128xi1>, vector<16x128xf32>
    %113 = vector.extract_strided_slice %112 {offsets = [0, 0], sizes = [16, 32], strides = [1, 1]} : vector<16x128xf32> to vector<16x32xf32>
    %114 = vector.extract_strided_slice %112 {offsets = [0, 32], sizes = [16, 32], strides = [1, 1]} : vector<16x128xf32> to vector<16x32xf32>
    %115 = vector.extract_strided_slice %112 {offsets = [0, 64], sizes = [16, 32], strides = [1, 1]} : vector<16x128xf32> to vector<16x32xf32>
    %116 = vector.extract_strided_slice %112 {offsets = [0, 96], sizes = [16, 32], strides = [1, 1]} : vector<16x128xf32> to vector<16x32xf32>
    %c0_62 = arith.constant 0 : index
    %c0_63 = arith.constant 0 : index
    %117 = vector.load %arg15[%c0_62, %c0_63] : memref<16x32xf32, #tpu.memory_space<vmem>>, vector<16x32xf32>
    %118 = arith.mulf %114, %117 : vector<16x32xf32>
    %119 = arith.mulf %113, %115 : vector<16x32xf32>
    %120 = arith.addf %118, %119 : vector<16x32xf32>
    %121 = math.tanh %120 : vector<16x32xf32>
    %122 = arith.mulf %116, %121 : vector<16x32xf32>
    %c0_64 = arith.constant 0 : index
    %c0_65 = arith.constant 0 : index
    %123 = vector.load %arg15[%c0_64, %c0_65] : memref<16x32xf32, #tpu.memory_space<vmem>>, vector<16x32xf32>
    tpu.vector_store %arg15[%c0_64, %c0_65], %120 {strides = array<i32>} : memref<16x32xf32, #tpu.memory_space<vmem>>, vector<16x32xf32>,
    %124 = vector.extract_strided_slice %122 {offsets = [0, 0], sizes = [8, 32], strides = [1, 1]} : vector<16x32xf32> to vector<8x32xf32>
    %c0_66 = arith.constant 0 : index
    %c0_67 = arith.constant 0 : index
    %125 = vector.load %arg14[%c0_66, %c0_67] : memref<16x64xf32, #tpu.memory_space<vmem>>, vector<8x32xf32>
    tpu.vector_store %arg14[%c0_66, %c0_67], %124 {strides = array<i32>} : memref<16x64xf32, #tpu.memory_space<vmem>>, vector<8x32xf32>,
    %126 = vector.extract_strided_slice %122 {offsets = [8, 0], sizes = [8, 32], strides = [1, 1]} : vector<16x32xf32> to vector<8x32xf32>
    %c8_68 = arith.constant 8 : index
    %c32_69 = arith.constant 32 : index
    %127 = vector.load %arg14[%c8_68, %c32_69] : memref<16x64xf32, #tpu.memory_space<vmem>>, vector<8x32xf32>
    tpu.vector_store %arg14[%c8_68, %c32_69], %126 {strides = array<i32>} : memref<16x64xf32, #tpu.memory_space<vmem>>, vector<8x32xf32>,
    %c3_i32_70 = arith.constant 3 : i32
    %128 = arith.index_cast %c3_i32_70 : i32 to index
    %c0_71 = arith.constant 0 : index
    %c0_72 = arith.constant 0 : index
    %129 = vector.load %arg12[%128, %c0_71, %c0_72] : memref<4x8x128xf32, #tpu.memory_space<vmem>>, vector<1x8x128xf32>
    %130 = vector.shape_cast %129 : vector<1x8x128xf32> to vector<8x128xf32>
    %c3_i32_73 = arith.constant 3 : i32
    %131 = arith.subi %c3_i32_73, %c3_i32_70 : i32
    %132 = arith.index_cast %131 : i32 to index
    %c0_74 = arith.constant 0 : index
    %c0_75 = arith.constant 0 : index
    %133 = vector.load %arg13[%132, %c0_74, %c0_75] : memref<4x8x128xf32, #tpu.memory_space<vmem>>, vector<1x8x128xf32>
    %134 = vector.shape_cast %133 : vector<1x8x128xf32> to vector<8x128xf32>
    %135 = tpu.concatenate %130, %134 in 0 : vector<8x128xf32>, vector<8x128xf32> -> vector<16x128xf32>
    %c0_76 = arith.constant 0 : index
    %c0_77 = arith.constant 0 : index
    %136 = vector.load %arg14[%c0_76, %c0_77] : memref<16x64xf32, #tpu.memory_space<vmem>>, vector<16x64xf32>
    %137 = arith.truncf %136 : vector<16x64xf32> to vector<16x64xbf16>
    %cst_78 = arith.constant dense<0.000000e+00> : vector<16x128xf32>
    %138 = tpu.matmul %137, %19, %cst_78 {dimension_numbers = #tpu.dot_dimension_numbers<[1], [0], [0], [1], [0, 0, 1, 1], [], []>} : vector<16x64xbf16>, vector<64x128xbf16>, vector<16x128xf32> -> vector<16x128xf32>
    %139 = arith.addf %138, %135 : vector<16x128xf32>
    %140 = math.tanh %139 : vector<16x128xf32>
    %141 = arith.negf %139 : vector<16x128xf32>
    %142 = math.exp %141 : vector<16x128xf32>
    %cst_79 = arith.constant 1.000000e+00 : f32
    %143 = vector.broadcast %cst_79 : f32 to vector<16x128xf32>
    %144 = arith.addf %143, %142 : vector<16x128xf32>
    %145 = arith.divf %143, %144 : vector<16x128xf32>
    %146 = arith.select %25, %140, %145 : vector<16x128xi1>, vector<16x128xf32>
    %147 = vector.extract_strided_slice %146 {offsets = [0, 0], sizes = [16, 32], strides = [1, 1]} : vector<16x128xf32> to vector<16x32xf32>
    %148 = vector.extract_strided_slice %146 {offsets = [0, 32], sizes = [16, 32], strides = [1, 1]} : vector<16x128xf32> to vector<16x32xf32>
    %149 = vector.extract_strided_slice %146 {offsets = [0, 64], sizes = [16, 32], strides = [1, 1]} : vector<16x128xf32> to vector<16x32xf32>
    %150 = vector.extract_strided_slice %146 {offsets = [0, 96], sizes = [16, 32], strides = [1, 1]} : vector<16x128xf32> to vector<16x32xf32>
    %c0_80 = arith.constant 0 : index
    %c0_81 = arith.constant 0 : index
    %151 = vector.load %arg15[%c0_80, %c0_81] : memref<16x32xf32, #tpu.memory_space<vmem>>, vector<16x32xf32>
    %152 = arith.mulf %148, %151 : vector<16x32xf32>
    %153 = arith.mulf %147, %149 : vector<16x32xf32>
    %154 = arith.addf %152, %153 : vector<16x32xf32>
    %155 = math.tanh %154 : vector<16x32xf32>
    %156 = arith.mulf %150, %155 : vector<16x32xf32>
    %c0_82 = arith.constant 0 : index
    %c0_83 = arith.constant 0 : index
    %157 = vector.load %arg15[%c0_82, %c0_83] : memref<16x32xf32, #tpu.memory_space<vmem>>, vector<16x32xf32>
    tpu.vector_store %arg15[%c0_82, %c0_83], %154 {strides = array<i32>} : memref<16x32xf32, #tpu.memory_space<vmem>>, vector<16x32xf32>,
    %158 = vector.extract_strided_slice %156 {offsets = [0, 0], sizes = [8, 32], strides = [1, 1]} : vector<16x32xf32> to vector<8x32xf32>
    %c0_84 = arith.constant 0 : index
    %c0_85 = arith.constant 0 : index
    %159 = vector.load %arg14[%c0_84, %c0_85] : memref<16x64xf32, #tpu.memory_space<vmem>>, vector<8x32xf32>
    tpu.vector_store %arg14[%c0_84, %c0_85], %158 {strides = array<i32>} : memref<16x64xf32, #tpu.memory_space<vmem>>, vector<8x32xf32>,
    %160 = vector.extract_strided_slice %156 {offsets = [8, 0], sizes = [8, 32], strides = [1, 1]} : vector<16x32xf32> to vector<8x32xf32>
    %c8_86 = arith.constant 8 : index
    %c32_87 = arith.constant 32 : index
    %161 = vector.load %arg14[%c8_86, %c32_87] : memref<16x64xf32, #tpu.memory_space<vmem>>, vector<8x32xf32>
    tpu.vector_store %arg14[%c8_86, %c32_87], %160 {strides = array<i32>} : memref<16x64xf32, #tpu.memory_space<vmem>>, vector<8x32xf32>,
    %c4_i32 = arith.constant 4 : i32
    %c1_i32_88 = arith.constant 1 : i32
    %162 = arith.cmpi eq, %arg0, %c1_i32_88 : i32
    %163 = arith.extui %162 : i1 to i32
    %c0_i32_89 = arith.constant 0 : i32
    %164 = arith.cmpi ne, %163, %c0_i32_89 : i32
    scf.if %164 {
      %c0_90 = arith.constant 0 : index
      %c0_91 = arith.constant 0 : index
      %165 = vector.load %arg14[%c0_90, %c0_91] : memref<16x64xf32, #tpu.memory_space<vmem>>, vector<8x32xf32>
      %c8_92 = arith.constant 8 : index
      %c32_93 = arith.constant 32 : index
      %166 = vector.load %arg14[%c8_92, %c32_93] : memref<16x64xf32, #tpu.memory_space<vmem>>, vector<8x32xf32>
      %167 = arith.truncf %165 : vector<8x32xf32> to vector<8x32xbf16>
      %c0_94 = arith.constant 0 : index
      %c0_95 = arith.constant 0 : index
      %168 = vector.load %arg8[%c0_94, %c0_95] : memref<32x64xbf16, #tpu.memory_space<vmem>>, vector<32x64xbf16>
      %cst_96 = arith.constant dense<0.000000e+00> : vector<8x64xf32>
      %169 = tpu.matmul %167, %168, %cst_96 {dimension_numbers = #tpu.dot_dimension_numbers<[1], [0], [0], [1], [0, 0, 1, 1], [], []>} : vector<8x32xbf16>, vector<32x64xbf16>, vector<8x64xf32> -> vector<8x64xf32>
      %170 = arith.truncf %166 : vector<8x32xf32> to vector<8x32xbf16>
      %c0_97 = arith.constant 0 : index
      %c0_98 = arith.constant 0 : index
      %171 = vector.load %arg9[%c0_97, %c0_98] : memref<32x64xbf16, #tpu.memory_space<vmem>>, vector<32x64xbf16>
      %cst_99 = arith.constant dense<0.000000e+00> : vector<8x64xf32>
      %172 = tpu.matmul %170, %171, %cst_99 {dimension_numbers = #tpu.dot_dimension_numbers<[1], [0], [0], [1], [0, 0, 1, 1], [], []>} : vector<8x32xbf16>, vector<32x64xbf16>, vector<8x64xf32> -> vector<8x64xf32>
      %173 = arith.addf %169, %172 : vector<8x64xf32>
      %c0_100 = arith.constant 0 : index
      %c0_101 = arith.constant 0 : index
      %174 = vector.load %arg10[%c0_100, %c0_101] : memref<1x64xf32, #tpu.memory_space<vmem>>, vector<1x64xf32>
      %175 = vector.broadcast %174 : vector<1x64xf32> to vector<8x64xf32>
      %176 = arith.addf %173, %175 : vector<8x64xf32>
      %177 = vector.extract_strided_slice %176 {offsets = [0, 0], sizes = [8, 32], strides = [1, 1]} : vector<8x64xf32> to vector<8x32xf32>
      %178 = arith.negf %177 : vector<8x32xf32>
      %179 = math.exp %178 : vector<8x32xf32>
      %cst_102 = arith.constant 1.000000e+00 : f32
      %180 = vector.broadcast %cst_102 : f32 to vector<8x32xf32>
      %181 = arith.addf %180, %179 : vector<8x32xf32>
      %182 = arith.divf %180, %181 : vector<8x32xf32>
      %183 = vector.extract_strided_slice %176 {offsets = [0, 32], sizes = [8, 32], strides = [1, 1]} : vector<8x64xf32> to vector<8x32xf32>
      %184 = math.tanh %183 : vector<8x32xf32>
      %185 = arith.mulf %182, %184 : vector<8x32xf32>
      %cst_103 = arith.constant 1.000000e+00 : f32
      %186 = vector.broadcast %cst_103 : f32 to vector<8x32xf32>
      %187 = arith.subf %186, %182 : vector<8x32xf32>
      %188 = arith.mulf %187, %165 : vector<8x32xf32>
      %189 = arith.addf %185, %188 : vector<8x32xf32>
      %c0_104 = arith.constant 0 : index
      %c0_105 = arith.constant 0 : index
      %190 = vector.load %arg11[%c0_104, %c0_105] : memref<8x32xf32, #tpu.memory_space<vmem>>, vector<8x32xf32>
      tpu.vector_store %arg11[%c0_104, %c0_105], %189 {strides = array<i32>} : memref<8x32xf32, #tpu.memory_space<vmem>>, vector<8x32xf32>,
    } else {
    }
    return
  }
  func.func @transform_0(%arg0: i32) -> (i32, i32) {
    %c0_i32 = arith.constant 0 : i32
    %c0_i32_0 = arith.constant 0 : i32
    return %arg0, %c0_i32 : i32, i32
  }
  func.func @transform_1(%arg0: i32) -> (i32, i32) {
    %c1_i32 = arith.constant 1 : i32
    %0 = arith.subi %c1_i32, %arg0 : i32
    %c0_i32 = arith.constant 0 : i32
    %c0_i32_0 = arith.constant 0 : i32
    return %0, %c0_i32 : i32, i32
  }
  func.func @transform_2(%arg0: i32) -> (i32, i32) {
    %c0_i32 = arith.constant 0 : i32
    %c0_i32_0 = arith.constant 0 : i32
    %c0_i32_1 = arith.constant 0 : i32
    return %c0_i32, %c0_i32_0 : i32, i32
  }
  func.func @transform_3(%arg0: i32) -> (i32, i32) {
    %c0_i32 = arith.constant 0 : i32
    %c0_i32_0 = arith.constant 0 : i32
    %c0_i32_1 = arith.constant 0 : i32
    return %c0_i32, %c0_i32_0 : i32, i32
  }
  func.func @transform_4(%arg0: i32) -> (i32, i32) {
    %c0_i32 = arith.constant 0 : i32
    %c0_i32_0 = arith.constant 0 : i32
    %c0_i32_1 = arith.constant 0 : i32
    return %c0_i32, %c0_i32_0 : i32, i32
  }
  func.func @transform_5(%arg0: i32) -> (i32, i32) {
    %c0_i32 = arith.constant 0 : i32
    %c0_i32_0 = arith.constant 0 : i32
    %c0_i32_1 = arith.constant 0 : i32
    return %c0_i32, %c0_i32_0 : i32, i32
  }
  func.func @transform_6(%arg0: i32) -> (i32, i32) {
    %c0_i32 = arith.constant 0 : i32
    %c0_i32_0 = arith.constant 0 : i32
    %c0_i32_1 = arith.constant 0 : i32
    return %c0_i32, %c0_i32_0 : i32, i32
  }
  func.func @transform_7(%arg0: i32) -> (i32, i32) {
    %c0_i32 = arith.constant 0 : i32
    %c0_i32_0 = arith.constant 0 : i32
    %c0_i32_1 = arith.constant 0 : i32
    return %c0_i32, %c0_i32_0 : i32, i32
  }
  func.func @transform_8(%arg0: i32) -> (i32, i32) {
    %c0_i32 = arith.constant 0 : i32
    %c0_i32_0 = arith.constant 0 : i32
    %c0_i32_1 = arith.constant 0 : i32
    return %c0_i32, %c0_i32_0 : i32, i32
  }
  func.func @transform_9(%arg0: i32) -> (i32, i32) {
    %c0_i32 = arith.constant 0 : i32
    %c0_i32_0 = arith.constant 0 : i32
    %c0_i32_1 = arith.constant 0 : i32
    return %c0_i32, %c0_i32_0 : i32, i32
  }
  func.func @transform_10(%arg0: i32) -> (i32, i32) {
    %c0_i32 = arith.constant 0 : i32
    %c0_i32_0 = arith.constant 0 : i32
    %c0_i32_1 = arith.constant 0 : i32
    return %c0_i32, %c0_i32_0 : i32, i32
  }
}

</mosaic_0001>

<bundles_post_ra>
// kernel: tpu_custom_call.1
= control target key start
LH: loop header
LB: loop body
LE: loop exit
PB: predicated region body
PF: predicated region fallthrough
CT: control target
= control target key end

     0   :  { %15 = vsyncpa [#allocation7], 0  ;;  %s1707_s13 = smov 0   ;;  %s1953_s0 = inlined_call_operand.vmem [shape: bf16[64,16], index: 0, kind: input, shape index: {}]   ;;  %s1954_s1 = inlined_call_operand.vmem [shape: bf16[64,16], index: 1, kind: input, shape index: {}]   ;;  %s1955_s2 = inlined_call_operand.vmem [shape: bf16[16,128], index: 2, kind: input, shape index: {}]   ;;  %s1956_s3 = inlined_call_operand.vmem [shape: bf16[16,128], index: 3, kind: input, shape index: {}]   ;;  %s1957_s4 = inlined_call_operand.vmem [shape: f32[1,128], index: 4, kind: input, shape index: {}]   ;;  %s1958_s5 = inlined_call_operand.vmem [shape: f32[1,128], index: 5, kind: input, shape index: {}]   ;;  %s1959_s6 = inlined_call_operand.vmem [shape: bf16[64,128], index: 6, kind: input, shape index: {}]   ;;  %s1960_s7 = inlined_call_operand.vmem [shape: bf16[32,64], index: 7, kind: input, shape index: {}]   ;;  %s1961_s8 = inlined_call_operand.vmem [shape: bf16[32,64], index: 8, kind: input, shape index: {}]   ;;  %s1962_s9 = inlined_call_operand.vmem [shape: f32[1,64], index: 9, kind: input, shape index: {}]   ;;  %s1963_s10 = inlined_call_operand.hbm [shape: f32[8,32], index: 10, kind: output, shape index: {}]  }
   0x1 LB: > { %s1713_s14 = sadd.s32 4294967295, %s1640_s13   ;;  %p1341_p0 = scmp.ge.s32.totalorder %s1640_s13, 1  ;;  %s1640_s13 = sphi %s1707_s13, %s21_s13  }
   0x2   : > { %p324_p1 = scmp.lt.s32.totalorder %s1640_s13, 3 }
   0x4   : > { %p325_p2 = pnand %p1341_p0, %p324_p1 }
   0x5   : > { %s1342_s15 = sshll.u32 (!%p325_p2), %s1713_s14, 2  ;;  %s369_s16 = ssub.s32 (!%p325_p2), 1, %s1713_s14 }
   0x6   : > { %328 = sbr.rel (%p325_p2) target bundleno = 3453 (0xd7d), region = 60  ;;  %p364_p3 = scmp.lt.s32.totalorder (!%p325_p2), %s1342_s15, 7 }
   0x7   : > { %s1344_s17 = sshll.u32 (!%p325_p2), %s369_s16, 2  ;;  %p1346_p5 = scmp.ne.s32.totalorder (!%p325_p2), %s1713_s14, 0 }
   0x8   : > { %p371_p4 = scmp.lt.s32.totalorder (!%p325_p2), %s1344_s17, 7 }
   0xd   : > { %s1967_s15 = smov (!%p364_p3, %s1342_s15), 7  ;;  %s1969_s17 = smov (!%p371_p4, %s1344_s17), 7 }
   0xe   : > { %s1343_s18 = sshll.u32 %s1967_s15, 2  ;;  %s1345_s22 = sshll.u32 %s1969_s17, 2  ;;  %vm382_vm0 = vcmask (!%p1346_p5), 523264   ;;  %vm385_vm1 = vcmask (!%p1346_p5), 261120   ;;  %v1642_v0 = vmov (!%p1346_p5), 0.0  }
   0xf   : > { %s367_s21 = scalar_lea.vmem %s1953_s0, %s1343_s18  ;;  %s374_s25 = scalar_lea.vmem %s1954_s1, %s1345_s22  ;;  %383 = vst.msk [vmem:[#allocation4] sm:$0xff] (!%p1346_p5), %vm382_vm0, %v1642_v0  ;;  %384 = vst.msk [vmem:[#allocation4 + $0x8] sm:$0xff] (!%p1346_p5), %vm382_vm0, %v1642_v0 }
  0x10   : > { %381 = sbr.rel (%p1346_p5) target bundleno = 23 (0x17), region = 64  ;;  %386 = vst.msk [vmem:[#allocation5] sm:$0xff] (!%p1346_p5), %vm385_vm1, %v1642_v0  ;;  %387 = vst.msk [vmem:[#allocation5 + $0x8] sm:$0xff] (!%p1346_p5), %vm385_vm1, %v1642_v0 }
  0x17 PF: > { %v1520_v1 = vld [vmem:[%s1955_s2] sm:$0xff]   ;;  %vm417_vm2 = vcmask 130048   ;;  %v1522_v3 = vld [vmem:[%s367_s21 + $0x8] sm:$0xff]   ;;  %v1643_v5 = vmov 0.0   ;;  %vm1644_vm3 = vmmov 0   ;;  %v669_v10 = vld [vmem:[#allocation5] sm:$0xff]  ;;  %v573_v44 = vlaneseq }
  0x18   : > { %v1521_v2 = vld [vmem:[%s367_s21] sm:$0xff]   ;;  %1420 = vmatprep.subr.bf16.mxu0 %v1520_v1  ;;  %v1743_v7 = vld [vmem:[%s1959_s6 + $0x8] sm:$0xff]   ;;  %v1755_v11 = vld [vmem:[%s1959_s6 + $0x10] sm:$0xff]   ;;  %s1645_s18 = smov 32   ;;  %vm608_vm4 = vcmask 523264   ;;  %s1647_s26 = smov 96  }
  0x19   : > { %1421 = vmatpush3.bf16.msra.mxu0 %v1520_v1  ;;  %1422 = vmatprep.mubr.msk.bf16.mxu0 %vm417_vm2, %v1521_v2  ;;  %v1733_v4 = vld [vmem:[%s1959_s6] sm:$0xff]   ;;  %v1528_v9 = vld [vmem:[%s374_s25 + $0x8] sm:$0xff]   ;;  %v670_v12 = vld [vmem:[#allocation5 + $0x8] sm:$0xff]  ;;  %v574_v48 = vand.u32 127, %v573_v44  ;;  %vm721_vm8 = vcmask 261120   ;;  %vm733_vm9 = vcmask 523520  }
  0x1a   : > { %1432 = vmatprep.subr.bf16.mxu0 %v1643_v5  ;;  %v1525_v6 = vld [vmem:[%s1956_s3] sm:$0xff]   ;;  %673 = vrot.lane.b32.xlu1 %v669_v10, %s1645_s18  ;;  %v1768_v13 = vld [vmem:[%s1959_s6 + $0x18] sm:$0xff]   ;;  %v582_v15 = vld [vmem:[#allocation4 + $0x8] sm:$0xff]  ;;  %p1375_p6 = scmp.ne.s32.totalorder %s1713_s14, 1 }
  0x1b   : > { %1426 = vmatprep.subr.bf16.mxu1 %v1525_v6  ;;  %v1527_v8 = vld [vmem:[%s374_s25] sm:$0xff]   ;;  %vm575_vm5 = vcmp.ge.s32.totalorder %v574_v48, 64  ;;  %vm576_vm6 = vcmp.lt.s32.totalorder %v574_v48, 96  ;;  %s1646_s25 = smov 64   ;;  %s1649_s11 = smov (!%p1375_p6), 96   ;;  %vm1650_vm10 = vmmov (!%p1375_p6), 0  }
  0x1c   : > { %1423 = vmatmul.mubr.msk.bf16.vlgmr.msra.gmra.mrb[0].mxu0 %vm417_vm2, %v1522_v3  ;;  %1427 = vmatpush3.bf16.msra.mxu1 %v1525_v6  ;;  %v581_v14 = vld [vmem:[#allocation4] sm:$0xff]  ;;  %vm1808_vm7 = vmand %vm575_vm5, %vm576_vm6 }
  0x1d   : > { %1433 = vmatpush3.bf16.msra.mxu0 %v1733_v4  ;;  %1428 = vmatprep.mubr.msk.bf16.mxu1 %vm417_vm2, %v1527_v8  ;;  %v583_v16 = vpack.c.bf16 %v582_v15, %v581_v14  ;;  %v1347_v17 = vld [vmem:[%s1957_s4] ss:$0 sm:$0xff] }
  0x1e   : > { %1434 = vmatprep.subr.bf16.mxu0 %v1643_v5  ;;  %1440 = vmatprep.mubr.msk.bf16.mxu0 %vm1644_vm3, %v1643_v5  ;;  %v1353_v24 = vld [vmem:[%s1958_s5] ss:$0 sm:$0xff] }
  0x1f   : > { %1444 = vmatprep.subr.bf16.mxu1 %v1643_v5  ;;  %1429 = vmatmul.mubr.msk.bf16.vlgmr.msra.gmra.mrb[0].mxu1 %vm417_vm2, %v1528_v9 }
  0x20   : > { %1445 = vmatpush3.bf16.msra.mxu1 %v1733_v4  ;;  %1452 = vmatprep.mubr.msk.bf16.mxu1 %vm1644_vm3, %v1643_v5 }
  0x21   : > { %1435 = vmatpush3.bf16.msra.mxu0 %v1743_v7  ;;  %1446 = vmatprep.subr.bf16.mxu1 %v1643_v5 }
  0x22   : > { %1436 = vmatprep.subr.bf16.mxu0 %v1643_v5  ;;  %675 = vrot.lane.b32.xlu1 %v670_v12, %s1645_s18 }
  0x24   : > { %1447 = vmatpush3.bf16.msra.mxu1 %v1743_v7 }
  0x25   : > { %1437 = vmatpush3.bf16.msra.mxu0 %v1755_v11  ;;  %1448 = vmatprep.subr.bf16.mxu1 %v1643_v5 }
  0x26   : > { %1438 = vmatprep.subr.bf16.mxu0 %v1643_v5 }
  0x28   : > { %1449 = vmatpush3.bf16.msra.mxu1 %v1755_v11 }
  0x29   : > { %1439 = vmatpush3.bf16.msra.mxu0 %v1768_v13  ;;  %1450 = vmatprep.subr.bf16.mxu1 %v1643_v5 }
  0x2a   : > { %1456 = vmatprep.subr.bf16.mxu0 %v1643_v5 }
  0x2c   : > { %1441 = vmatmul.mubr.msk.bf16.vlgmr.msra.gmra.mrb[4].mxu0 %vm608_vm4, %v583_v16  ;;  %1451 = vmatpush3.bf16.msra.mxu1 %v1768_v13 }
  0x2d   : > { %1457 = vmatpush3.bf16.msra.mxu0 %v1733_v4  ;;  %1464 = vmatprep.mubr.msk.bf16.mxu0 %vm1644_vm3, %v1643_v5 }
  0x2e   : > { %1458 = vmatprep.subr.bf16.mxu0 %v1643_v5  ;;  %1468 = vmatprep.subr.bf16.mxu1 %v1643_v5 }
  0x31   : > { %1459 = vmatpush3.bf16.msra.mxu0 %v1743_v7 }
  0x32   : > { %1460 = vmatprep.subr.bf16.mxu0 %v1643_v5 }
  0x35   : > { %1461 = vmatpush3.bf16.msra.mxu0 %v1755_v11 }
  0x36   : > { %1462 = vmatprep.subr.bf16.mxu0 %v1643_v5 }
  0x39   : > { %1463 = vmatpush3.bf16.msra.mxu0 %v1768_v13 }
  0x8c   : > { %v674_v60 = vpop.permute.xlu1 %673 }
  0x94   : > { %v676_v62 = vpop.permute.xlu1 %675 }
  0xef   : > { %v1424_v18 = vpop.f32.mrb[0].mxu0 }
  0xf0   : > { %v1793_v19 = vadd.f32 %v1424_v18, %v1347_v17  ;;  %v458_v20 = vpop.f32.mrb[1].mxu0 }
  0xf1   : > { %v1425_v21 = vpop.f32.mrb[2].mxu0  ;;  %v459_v33 = vadd.f32 %v1347_v17, %v458_v20 }
  0xf2   : > { %v1795_v22 = vadd.f32 %v1425_v21, %v1347_v17  ;;  %v461_v23 = vpop.f32.mrb[3].mxu0  ;;  %v1430_v26 = vpop.f32.mrb[0].mxu1 }
  0xf3   : > { %v1800_v25 = vadd.f32 %v1347_v17, %v461_v23  ;;  %v1802_v27 = vadd.f32 %v1430_v26, %v1353_v24  ;;  %v542_v28 = vpop.f32.mrb[1].mxu1 }
  0xf4   : > { %v1804_v29 = vadd.f32 %v1353_v24, %v542_v28  ;;  %v1431_v30 = vpop.f32.mrb[2].mxu1 }
  0xf5   : > { %v545_v31 = vpop.f32.mrb[3].mxu1  ;;  %v554_v34 = vadd.f32 %v1431_v30, %v1353_v24 }
  0xf6   : > { %v1806_v32 = vadd.f32 %v1353_v24, %v545_v31 }
  0xff   : > { %v646_v35 = vpop.f32.mrb[4].mxu0 }
 0x100   : > { %v647_v36 = vadd.f32 %v646_v35, %v459_v33  ;;  %v1442_v37 = vpop.f32.mrb[5].mxu0 }
 0x101   : > { %v649_v38 = vpop.f32.mrb[6].mxu0 }
 0x102   : > { %v1364_v39 = vmul.f32 -1.442695, %v647_v36  ;;  %v650_v40 = vadd.f32 %v649_v38, %v554_v34  ;;  %v1443_v41 = vpop.f32.mrb[7].mxu0 }
 0x104   : > { %1530 = vpow2.f32 %v1364_v39  ;;  %v1365_v42 = vmul.f32 -1.442695, %v650_v40 }
 0x106   : > { %1532 = vpow2.f32 %v1365_v42 }
 0x107   : > { %1534 = vtanh.f32 %v647_v36 }
 0x10e   : > { %v1531_v43 = vpop.eup %1530 }
 0x10f   : > { %v661_v45 = vadd.f32 1.0, %v1531_v43 }
 0x110   : > { %v1533_v46 = vpop.eup %1532 }
 0x111   : > { %1536 = vrcp.f32 %v661_v45  ;;  %v662_v47 = vadd.f32 1.0, %v1533_v46  ;;  %v1535_v50 = vpop.eup %1534 }
 0x113   : > { %1538 = vrcp.f32 %v662_v47 }
 0x114   : > { %1540 = vtanh.f32 %v650_v40 }
 0x11b   : > { %v1537_v51 = vpop.eup %1536 }
 0x11c   : > { %v667_v52 = vsel %vm1808_vm7, %v1535_v50, %v1537_v51 }
 0x11d   : > { %v1539_v53 = vpop.eup %1538  ;;  %683 = vrot.lane.b32.xlu0 %v667_v52, %s1646_s25  ;;  %v679_v61 = vmul.f32 %v674_v60, %v667_v52 }
 0x11e   : > { %v1541_v54 = vpop.eup %1540 }
 0x11f   : > { %v668_v55 = vsel %vm1808_vm7, %v1541_v54, %v1539_v53 }
 0x120   : > { %v680_v1 = vmul.f32 %v676_v62, %v668_v55 }
 0x121   : > { %685 = vrot.lane.b32.xlu0 %v668_v55, %s1646_s25 }
 0x18f   : > { %v684_v56 = vpop.permute.xlu0 %683 }
 0x190   : > { %v689_v57 = vmul.f32 %v684_v56, %v667_v52 }
 0x192   : > { %693 = vrot.lane.b32.xlu0 %v689_v57, %s1645_s18 }
 0x193   : > { %v686_v58 = vpop.permute.xlu0 %685 }
 0x194   : > { %v690_v59 = vmul.f32 %v686_v58, %v668_v55 }
 0x196   : > { %695 = vrot.lane.b32.xlu1 %v690_v59, %s1645_s18 }
 0x204   : > { %v694_v63 = vpop.permute.xlu0 %693 }
 0x205   : > { %v699_v0 = vadd.f32 %v694_v63, %v679_v61 }
 0x207   : > { %1542 = vtanh.f32 %v699_v0 }
 0x208   : > { %v696_v2 = vpop.permute.xlu1 %695 }
 0x209   : > { %v700_v3 = vadd.f32 %v696_v2, %v680_v1 }
 0x20b   : > { %1544 = vtanh.f32 %v700_v3 }
 0x211   : > { %v1543_v6 = vpop.eup %1542 }
 0x212   : > { %705 = vrot.lane.b32.xlu0 %v1543_v6, %s1646_s25 }
 0x215   : > { %v1545_v8 = vpop.eup %1544 }
 0x216   : > { %707 = vrot.lane.b32.xlu1 %v1545_v8, %s1646_s25 }
 0x284   : > { %v706_v9 = vpop.permute.xlu0 %705 }
 0x285   : > { %v711_v10 = vmul.f32 %v706_v9, %v667_v52 }
 0x287   : > { %725 = vrot.lane.b32.xlu0 %v711_v10, %s1645_s18 }
 0x288   : > { %v708_v12 = vpop.permute.xlu1 %707 }
 0x289   : > { %v712_v14 = vmul.f32 %v708_v12, %v668_v55 }
 0x28b   : > { %730 = vrot.lane.b32.xlu1 %v712_v14, %s1646_s25  ;;  %715 = vrot.lane.b32.xlu0 %v699_v0, %s1647_s26 }
 0x28f   : > { %717 = vrot.lane.b32.xlu1 %v700_v3, %s1647_s26 }
 0x2f9   : > { %v726_v15 = vpop.permute.xlu0 %725 }
 0x2fa   : > { %728 = vst.msk [vmem:[#allocation4] sm:$0xff] %vm721_vm8, %v726_v15 }
 0x2fd   : > { %v731_v16 = vpop.permute.xlu1 %730  ;;  %v716_v17 = vpop.permute.xlu0 %715 }
 0x2fe   : > { %734 = vst.msk [vmem:[#allocation4 + $0x8] sm:$0xff] %vm733_vm9, %v731_v16 }
 0x2ff   : > { %722 = vst.msk [vmem:[#allocation5] sm:$0xff] %vm721_vm8, %v716_v17 }
 0x301   : > { %v718_v18 = vpop.permute.xlu1 %717  ;;  %v739_v20 = vld [vmem:[#allocation4] sm:$0xff] }
 0x302   : > { %723 = vst.msk [vmem:[#allocation5 + $0x8] sm:$0xff] %vm721_vm8, %v718_v18 }
 0x305   : > { %v740_v21 = vld [vmem:[#allocation4 + $0x8] sm:$0xff] }
 0x306   : > { %v741_v23 = vpack.c.bf16 %v740_v21, %v739_v20  ;;  %v802_v39 = vld [vmem:[#allocation5] sm:$0xff] }
 0x308   : > { %1453 = vmatmul.mubr.msk.bf16.vlgmr.msra.gmra.mrb[4].mxu1 %vm608_vm4, %v741_v23 }
 0x309   : > { %1469 = vmatpush3.bf16.msra.mxu1 %v1733_v4  ;;  %1476 = vmatprep.mubr.msk.bf16.mxu1 %vm1644_vm3, %v1643_v5  ;;  %v803_v40 = vld [vmem:[#allocation5 + $0x8] sm:$0xff] }
 0x30a   : > { %1470 = vmatprep.subr.bf16.mxu1 %v1643_v5 }
 0x30d   : > { %1471 = vmatpush3.bf16.msra.mxu1 %v1743_v7 }
 0x30e   : > { %1472 = vmatprep.subr.bf16.mxu1 %v1643_v5 }
 0x311   : > { %1473 = vmatpush3.bf16.msra.mxu1 %v1755_v11 }
 0x312   : > { %1474 = vmatprep.subr.bf16.mxu1 %v1643_v5 }
 0x315   : > { %1475 = vmatpush3.bf16.msra.mxu1 %v1768_v13 }
 0x3db   : > { %v779_v24 = vpop.f32.mrb[4].mxu1 }
 0x3dc   : > { %v780_v26 = vadd.f32 %v779_v24, %v1800_v25  ;;  %v1454_v28 = vpop.f32.mrb[5].mxu1 }
 0x3dd   : > { %v782_v4 = vpop.f32.mrb[6].mxu1 }
 0x3de   : > { %v1367_v30 = vmul.f32 -1.442695, %v780_v26  ;;  %v783_v31 = vadd.f32 %v782_v4, %v1802_v27  ;;  %v1455_v33 = vpop.f32.mrb[7].mxu1 }
 0x3e0   : > { %1546 = vpow2.f32 %v1367_v30  ;;  %v1368_v34 = vmul.f32 -1.442695, %v783_v31 }
 0x3e2   : > { %1548 = vpow2.f32 %v1368_v34 }
 0x3e3   : > { %1550 = vtanh.f32 %v780_v26 }
 0x3ea   : > { %v1547_v7 = vpop.eup %1546 }
 0x3eb   : > { %v794_v35 = vadd.f32 1.0, %v1547_v7 }
 0x3ec   : > { %v1549_v36 = vpop.eup %1548 }
 0x3ed   : > { %1552 = vrcp.f32 %v794_v35  ;;  %v795_v5 = vadd.f32 1.0, %v1549_v36  ;;  %v1551_v11 = vpop.eup %1550 }
 0x3ee   : > { %1554 = vtanh.f32 %v783_v31 }
 0x3ef   : > { %1556 = vrcp.f32 %v795_v5 }
 0x3f7   : > { %v1553_v13 = vpop.eup %1552 }
 0x3f8   : > { %v1555_v25 = vpop.eup %1554  ;;  %v800_v37 = vsel %vm1808_vm7, %v1551_v11, %v1553_v13 }
 0x3f9   : > { %v1557_v38 = vpop.eup %1556  ;;  %816 = vrot.lane.b32.xlu0 %v800_v37, %s1646_s25 }
 0x3fa   : > { %v801_v27 = vsel %vm1808_vm7, %v1555_v25, %v1557_v38 }
 0x3fb   : > { %818 = vrot.lane.b32.xlu1 %v801_v27, %s1646_s25 }
 0x3fd   : > { %806 = vrot.lane.b32.xlu0 %v802_v39, %s1645_s18 }
 0x3ff   : > { %808 = vrot.lane.b32.xlu1 %v803_v40, %s1645_s18 }
 0x46b   : > { %v817_v41 = vpop.permute.xlu0 %816 }
 0x46c   : > { %v822_v42 = vmul.f32 %v817_v41, %v800_v37 }
 0x46d   : > { %v819_v43 = vpop.permute.xlu1 %818 }
 0x46e   : > { %v823_v44 = vmul.f32 %v819_v43, %v801_v27  ;;  %826 = vrot.lane.b32.xlu0 %v822_v42, %s1645_s18 }
 0x46f   : > { %v807_v45 = vpop.permute.xlu0 %806 }
 0x470   : > { %828 = vrot.lane.b32.xlu1 %v823_v44, %s1645_s18  ;;  %v812_v47 = vmul.f32 %v807_v45, %v800_v37 }
 0x471   : > { %v809_v46 = vpop.permute.xlu1 %808 }
 0x472   : > { %v813_v50 = vmul.f32 %v809_v46, %v801_v27 }
 0x4e0   : > { %v827_v48 = vpop.permute.xlu0 %826 }
 0x4e1   : > { %v832_v51 = vadd.f32 %v827_v48, %v812_v47 }
 0x4e2   : > { %v829_v52 = vpop.permute.xlu1 %828 }
 0x4e3   : > { %1558 = vtanh.f32 %v832_v51  ;;  %v833_v53 = vadd.f32 %v829_v52, %v813_v50 }
 0x4e5   : > { %1560 = vtanh.f32 %v833_v53 }
 0x4ed   : > { %v1559_v54 = vpop.eup %1558 }
 0x4ee   : > { %838 = vrot.lane.b32.xlu0 %v1559_v54, %s1646_s25 }
 0x4ef   : > { %v1561_v55 = vpop.eup %1560 }
 0x4f0   : > { %840 = vrot.lane.b32.xlu1 %v1561_v55, %s1646_s25 }
 0x560   : > { %v839_v56 = vpop.permute.xlu0 %838 }
 0x561   : > { %v844_v57 = vmul.f32 %v839_v56, %v800_v37 }
 0x562   : > { %v841_v58 = vpop.permute.xlu1 %840 }
 0x563   : > { %v845_v59 = vmul.f32 %v841_v58, %v801_v27  ;;  %857 = vrot.lane.b32.xlu0 %v844_v57, %s1645_s18 }
 0x565   : > { %862 = vrot.lane.b32.xlu1 %v845_v59, %s1646_s25 }
 0x567   : > { %848 = vrot.lane.b32.xlu0 %v832_v51, %s1647_s26 }
 0x569   : > { %850 = vrot.lane.b32.xlu1 %v833_v53, %s1647_s26 }
 0x5d5   : > { %v858_v60 = vpop.permute.xlu0 %857 }
 0x5d6   : > { %860 = vst.msk [vmem:[#allocation4] sm:$0xff] %vm721_vm8, %v858_v60 }
 0x5d7   : > { %v863_v61 = vpop.permute.xlu1 %862 }
 0x5d8   : > { %865 = vst.msk [vmem:[#allocation4 + $0x8] sm:$0xff] %vm733_vm9, %v863_v61 }
 0x5d9   : > { %v849_v62 = vpop.permute.xlu0 %848 }
 0x5da   : > { %854 = vst.msk [vmem:[#allocation5] sm:$0xff] %vm721_vm8, %v849_v62 }
 0x5db   : > { %v851_v63 = vpop.permute.xlu1 %850 }
 0x5dc   : > { %855 = vst.msk [vmem:[#allocation5 + $0x8] sm:$0xff] %vm721_vm8, %v851_v63 }
 0x5dd   : > { %v870_v0 = vld [vmem:[#allocation4] sm:$0xff] }
 0x5df   : > { %v871_v1 = vld [vmem:[#allocation4 + $0x8] sm:$0xff] }
 0x5e0   : > { %v872_v2 = vpack.c.bf16 %v871_v1, %v870_v0 }
 0x5e1   : > { %v933_v28 = vld [vmem:[#allocation5] sm:$0xff] }
 0x5e2   : > { %1465 = vmatmul.mubr.msk.bf16.vlgmr.msra.gmra.mrb[8].mxu0 %vm608_vm4, %v872_v2 }
 0x5e3   : > { %v934_v4 = vld [vmem:[#allocation5 + $0x8] sm:$0xff] }
 0x6b5   : > { %v910_v3 = vpop.f32.mrb[8].mxu0 }
 0x6b6   : > { %v911_v6 = vadd.f32 %v910_v3, %v1793_v19  ;;  %v1466_v8 = vpop.f32.mrb[9].mxu0 }
 0x6b7   : > { %v913_v9 = vpop.f32.mrb[10].mxu0 }
 0x6b8   : > { %v1370_v10 = vmul.f32 -1.442695, %v911_v6  ;;  %v914_v12 = vadd.f32 %v913_v9, %v1806_v32  ;;  %v1467_v14 = vpop.f32.mrb[11].mxu0 }
 0x6ba   : > { %1562 = vpow2.f32 %v1370_v10  ;;  %v1371_v15 = vmul.f32 -1.442695, %v914_v12 }
 0x6bc   : > { %1564 = vpow2.f32 %v1371_v15 }
 0x6bd   : > { %1566 = vtanh.f32 %v911_v6 }
 0x6c4   : > { %v1563_v16 = vpop.eup %1562 }
 0x6c5   : > { %v925_v17 = vadd.f32 1.0, %v1563_v16 }
 0x6c6   : > { %v1565_v18 = vpop.eup %1564 }
 0x6c7   : > { %1568 = vrcp.f32 %v925_v17  ;;  %v926_v20 = vadd.f32 1.0, %v1565_v18  ;;  %v1567_v21 = vpop.eup %1566 }
 0x6c8   : > { %1570 = vtanh.f32 %v914_v12 }
 0x6c9   : > { %1572 = vrcp.f32 %v926_v20 }
 0x6d1   : > { %v1569_v23 = vpop.eup %1568 }
 0x6d2   : > { %v1571_v19 = vpop.eup %1570  ;;  %v931_v24 = vsel %vm1808_vm7, %v1567_v21, %v1569_v23 }
 0x6d3   : > { %v1573_v26 = vpop.eup %1572  ;;  %947 = vrot.lane.b32.xlu0 %v931_v24, %s1646_s25 }
 0x6d4   : > { %v932_v32 = vsel %vm1808_vm7, %v1571_v19, %v1573_v26 }
 0x6d5   : > { %949 = vrot.lane.b32.xlu1 %v932_v32, %s1646_s25 }
 0x6d7   : > { %937 = vrot.lane.b32.xlu0 %v933_v28, %s1645_s18 }
 0x6d9   : > { %939 = vrot.lane.b32.xlu1 %v934_v4, %s1645_s18 }
 0x745   : > { %v948_v30 = vpop.permute.xlu0 %947 }
 0x746   : > { %v953_v31 = vmul.f32 %v948_v30, %v931_v24 }
 0x747   : > { %v950_v33 = vpop.permute.xlu1 %949 }
 0x748   : > { %v954_v34 = vmul.f32 %v950_v33, %v932_v32  ;;  %957 = vrot.lane.b32.xlu0 %v953_v31, %s1645_s18 }
 0x749   : > { %v938_v7 = vpop.permute.xlu0 %937 }
 0x74a   : > { %959 = vrot.lane.b32.xlu1 %v954_v34, %s1645_s18  ;;  %v943_v36 = vmul.f32 %v938_v7, %v931_v24  ;;  %v1594_v7 = vld [vmem:[%s1960_s7] sm:$0xff] (!%p1375_p6)  }
 0x74b   : > { %v940_v35 = vpop.permute.xlu1 %939 }
 0x74c   : > { %v944_v11 = vmul.f32 %v940_v35, %v932_v32 }
 0x7ba   : > { %v958_v5 = vpop.permute.xlu0 %957 }
 0x7bb   : > { %v963_v13 = vadd.f32 %v958_v5, %v943_v36  ;;  %v1648_v36 = vmov (!%p1375_p6), 0.0   ;;  %v1595_v5 = vld [vmem:[%s1961_s8] sm:$0xff] (!%p1375_p6)  }
 0x7bc   : > { %v960_v25 = vpop.permute.xlu1 %959  ;;  %1488 = vmatprep.subr.bf16.mxu1 (!%p1375_p6), %v1648_v36  ;;  %1480 = vmatprep.subr.bf16.mxu0 (!%p1375_p6), %v1648_v36 }
 0x7bd   : > { %1574 = vtanh.f32 %v963_v13  ;;  %v964_v37 = vadd.f32 %v960_v25, %v944_v11  ;;  %v1596_v11 = vld [vmem:[%s1960_s7 + $0x8] sm:$0xff] (!%p1375_p6)   ;;  %1481 = vmatpush3.bf16.msra.mxu0 (!%p1375_p6), %v1595_v5  ;;  %1484 = vmatprep.mubr.msk.bf16.mxu0 (!%p1375_p6), %vm1650_vm10, %v1648_v36 }
 0x7be   : > { %1482 = vmatprep.subr.bf16.mxu0 (!%p1375_p6), %v1648_v36 }
 0x7bf   : > { %1576 = vtanh.f32 %v964_v37 }
 0x7c7   : > { %v1575_v38 = vpop.eup %1574 }
 0x7c8   : > { %969 = vrot.lane.b32.xlu0 %v1575_v38, %s1646_s25 }
 0x7c9   : > { %v1577_v27 = vpop.eup %1576 }
 0x7ca   : > { %971 = vrot.lane.b32.xlu1 %v1577_v27, %s1646_s25 }
 0x83a   : > { %v970_v39 = vpop.permute.xlu0 %969 }
 0x83b   : > { %v975_v40 = vmul.f32 %v970_v39, %v931_v24 }
 0x83c   : > { %v972_v41 = vpop.permute.xlu1 %971 }
 0x83d   : > { %v976_v42 = vmul.f32 %v972_v41, %v932_v32  ;;  %988 = vrot.lane.b32.xlu0 %v975_v40, %s1645_s18 }
 0x83f   : > { %993 = vrot.lane.b32.xlu1 %v976_v42, %s1646_s25 }
 0x841   : > { %979 = vrot.lane.b32.xlu0 %v963_v13, %s1647_s26  ;;  %v1597_v13 = vld [vmem:[%s1961_s8 + $0x8] sm:$0xff] (!%p1375_p6)  }
 0x842   : > { %1483 = vmatpush3.bf16.msra.mxu0 (!%p1375_p6), %v1597_v13 }
 0x843   : > { %981 = vrot.lane.b32.xlu1 %v964_v37, %s1647_s26 }
 0x8af   : > { %v989_v43 = vpop.permute.xlu0 %988 }
 0x8b0   : > { %991 = vst.msk [vmem:[#allocation4] sm:$0xff] %vm721_vm8, %v989_v43  ;;  %v1382_v43 = vld [vmem:[%s1962_s9] ss:$0 sm:$0xff] (!%p1375_p6) }
 0x8b1   : > { %v994_v44 = vpop.permute.xlu1 %993 }
 0x8b2   : > { %996 = vst.msk [vmem:[#allocation4 + $0x8] sm:$0xff] %vm733_vm9, %v994_v44 }
 0x8b3   : > { %v980_v45 = vpop.permute.xlu0 %979 }
 0x8b4   : > { %985 = vst.msk [vmem:[#allocation5] sm:$0xff] %vm721_vm8, %v980_v45 }
 0x8b5   : > { %v982_v46 = vpop.permute.xlu1 %981 }
 0x8b6   : > { %986 = vst.msk [vmem:[#allocation5 + $0x8] sm:$0xff] %vm721_vm8, %v982_v46 }
 0x8b7   : > { %v1000_v47 = vld [vmem:[#allocation4] sm:$0xff] }
 0x8b9   : > { %v1001_v48 = vld [vmem:[#allocation4 + $0x8] sm:$0xff] }
 0x8ba   : > { %v1002_v50 = vpack.c.bf16 %v1001_v48, %v1000_v47 }
 0x8bb   : > { %v1063_v3 = vld [vmem:[#allocation5] sm:$0xff] }
 0x8bc   : > { %1477 = vmatmul.mubr.msk.bf16.vlgmr.msra.gmra.mrb[8].mxu1 %vm608_vm4, %v1002_v50 }
 0x8bd   : > { %v1064_v6 = vld [vmem:[#allocation5 + $0x8] sm:$0xff]  ;;  %1489 = vmatpush3.bf16.msra.mxu1 (!%p1375_p6), %v1594_v7  ;;  %1492 = vmatprep.mubr.msk.bf16.mxu1 (!%p1375_p6), %vm1650_vm10, %v1648_v36 }
 0x8be   : > { %1490 = vmatprep.subr.bf16.mxu1 (!%p1375_p6), %v1648_v36 }
 0x8c1   : > { %1491 = vmatpush3.bf16.msra.mxu1 (!%p1375_p6), %v1596_v11 }
 0x98f   : > { %v1040_v51 = vpop.f32.mrb[8].mxu1 }
 0x990   : > { %v1041_v52 = vadd.f32 %v1040_v51, %v1795_v22  ;;  %v1478_v53 = vpop.f32.mrb[9].mxu1 }
 0x991   : > { %v1043_v54 = vpop.f32.mrb[10].mxu1 }
 0x992   : > { %v1373_v55 = vmul.f32 -1.442695, %v1041_v52  ;;  %v1044_v56 = vadd.f32 %v1043_v54, %v1804_v29  ;;  %v1479_v57 = vpop.f32.mrb[11].mxu1 }
 0x994   : > { %1578 = vpow2.f32 %v1373_v55  ;;  %v1374_v58 = vmul.f32 -1.442695, %v1044_v56 }
 0x996   : > { %1580 = vpow2.f32 %v1374_v58 }
 0x997   : > { %1582 = vtanh.f32 %v1041_v52 }
 0x99e   : > { %v1579_v59 = vpop.eup %1578 }
 0x99f   : > { %v1055_v60 = vadd.f32 1.0, %v1579_v59 }
 0x9a0   : > { %v1581_v61 = vpop.eup %1580 }
 0x9a1   : > { %1584 = vrcp.f32 %v1055_v60  ;;  %v1056_v62 = vadd.f32 1.0, %v1581_v61  ;;  %v1583_v63 = vpop.eup %1582 }
 0x9a2   : > { %1586 = vtanh.f32 %v1044_v56 }
 0x9a3   : > { %1588 = vrcp.f32 %v1056_v62 }
 0x9ab   : > { %v1585_v0 = vpop.eup %1584 }
 0x9ac   : > { %v1587_v22 = vpop.eup %1586  ;;  %v1061_v1 = vsel %vm1808_vm7, %v1583_v63, %v1585_v0 }
 0x9ad   : > { %v1589_v2 = vpop.eup %1588  ;;  %1077 = vrot.lane.b32.xlu0 %v1061_v1, %s1646_s25 }
 0x9ae   : > { %v1062_v29 = vsel %vm1808_vm7, %v1587_v22, %v1589_v2 }
 0x9af   : > { %1079 = vrot.lane.b32.xlu1 %v1062_v29, %s1646_s25 }
 0x9b1   : > { %1067 = vrot.lane.b32.xlu0 %v1063_v3, %s1645_s18 }
 0x9b3   : > { %1069 = vrot.lane.b32.xlu1 %v1064_v6, %s1645_s18 }
 0xa1f   : > { %v1078_v8 = vpop.permute.xlu0 %1077 }
 0xa20   : > { %v1083_v9 = vmul.f32 %v1078_v8, %v1061_v1 }
 0xa21   : > { %v1080_v10 = vpop.permute.xlu1 %1079 }
 0xa22   : > { %v1084_v12 = vmul.f32 %v1080_v10, %v1062_v29  ;;  %1087 = vrot.lane.b32.xlu0 %v1083_v9, %s1645_s18 }
 0xa23   : > { %v1068_v14 = vpop.permute.xlu0 %1067 }
 0xa24   : > { %1089 = vrot.lane.b32.xlu1 %v1084_v12, %s1645_s18  ;;  %v1073_v49 = vmul.f32 %v1068_v14, %v1061_v1 }
 0xa25   : > { %v1070_v15 = vpop.permute.xlu1 %1069 }
 0xa26   : > { %v1074_v17 = vmul.f32 %v1070_v15, %v1062_v29 }
 0xa94   : > { %v1088_v16 = vpop.permute.xlu0 %1087 }
 0xa95   : > { %v1093_v18 = vadd.f32 %v1088_v16, %v1073_v49 }
 0xa96   : > { %v1090_v20 = vpop.permute.xlu1 %1089 }
 0xa97   : > { %1590 = vtanh.f32 %v1093_v18  ;;  %v1094_v21 = vadd.f32 %v1090_v20, %v1074_v17 }
 0xa99   : > { %1592 = vtanh.f32 %v1094_v21 }
 0xaa1   : > { %v1591_v23 = vpop.eup %1590 }
 0xaa2   : > { %1099 = vrot.lane.b32.xlu0 %v1591_v23, %s1646_s25 }
 0xaa3   : > { %v1593_v19 = vpop.eup %1592 }
 0xaa4   : > { %1101 = vrot.lane.b32.xlu1 %v1593_v19, %s1646_s25 }
 0xaa6   : > { %1109 = vrot.lane.b32.xlu0 %v1093_v18, %s1647_s26 }
 0xaa8   : > { %1111 = vrot.lane.b32.xlu1 %v1094_v21, %s1647_s26 }
 0xb14   : > { %v1100_v24 = vpop.permute.xlu0 %1099 }
 0xb15   : > { %v1105_v26 = vmul.f32 %v1100_v24, %v1061_v1 }
 0xb16   : > { %v1102_v32 = vpop.permute.xlu1 %1101 }
 0xb17   : > { %v1106_v28 = vmul.f32 %v1102_v32, %v1062_v29  ;;  %1118 = vrot.lane.b32.xlu0 %v1105_v26, %s1645_s18 }
 0xb18   : > { %v1110_v4 = vpop.permute.xlu0 %1109 }
 0xb19   : > { %1115 = vst.msk [vmem:[#allocation5] sm:$0xff] %vm721_vm8, %v1110_v4  ;;  %1123 = vrot.lane.b32.xlu1 %v1106_v28, %s1646_s25 }
 0xb1a   : > { %v1112_v30 = vpop.permute.xlu1 %1111 }
 0xb1b   : > { %1116 = vst.msk [vmem:[#allocation5 + $0x8] sm:$0xff] %vm721_vm8, %v1112_v30 }
 0xb86   : > { %1130 = sbr.rel (%p1375_p6) target bundleno = 3428 (0xd64), region = 68 }
 0xb89   : > { %v1119_v31 = vpop.permute.xlu0 %1118 }
 0xb8a   : > { %1121 = vst.msk [vmem:[#allocation4] sm:$0xff] %vm721_vm8, %v1119_v31 }
 0xb8b   : > { %v1124_v33 = vpop.permute.xlu1 %1123 }
 0xb8c   : > { %1126 = vst.msk [vmem:[#allocation4 + $0x8] sm:$0xff] %vm733_vm9, %v1124_v33 }
 0xb91   : > { %v1131_v25 = vld [vmem:[#allocation4] sm:$0xff] }
 0xb92   : > { %v1133_v37 = vpack.c.bf16 %v1131_v25, %v1131_v25 }
 0xb93   : > { %v1132_v34 = vld [vmem:[#allocation4 + $0x8] sm:$0xff] }
 0xb94   : > { %v1138_v35 = vpack.c.bf16 %v1132_v34, %v1132_v34  ;;  %1493 = vmatmul.mubr.msk.bf16.vlgmr.msra.gmra.mrb[0].mxu1 %vm721_vm8, %v1133_v37 }
 0xb96   : > { %1144 = vrot.lane.b32.xlu0 %v1138_v35, %s1649_s11 }
 0xc08   : > { %v1145_v38 = vpop.permute.xlu0 %1144 }
 0xc09   : > { %1485 = vmatmul.mubr.msk.bf16.vlgmr.msra.gmra.mrb[0].mxu0 %vm721_vm8, %v1145_v38 }
 0xc67   : > { %v1250_v27 = vpop.f32.mrb[0].mxu1 }
 0xc68   : > { %v1494_v39 = vpop.f32.mrb[1].mxu1 }
 0xc69   : > { %v1253_v40 = vpop.f32.mrb[2].mxu1 }
 0xc6a   : > { %v1495_v41 = vpop.f32.mrb[3].mxu1 }
 0xcdc   : > { %v1195_v42 = vpop.f32.mrb[0].mxu0 }
 0xcdd   : > { %v1251_v44 = vadd.f32 %v1250_v27, %v1195_v42  ;;  %v1486_v45 = vpop.f32.mrb[1].mxu0 }
 0xcde   : > { %v1198_v46 = vpop.f32.mrb[2].mxu0 }
 0xcdf   : > { %v1263_v47 = vadd.f32 %v1382_v43, %v1251_v44  ;;  %v1487_v48 = vpop.f32.mrb[3].mxu0 }
 0xce1   : > { %1598 = vtanh.f32 %v1263_v47  ;;  %v1383_v51 = vmul.f32 -1.442695, %v1263_v47 }
 0xce3   : > { %1600 = vpow2.f32 %v1383_v51 }
 0xceb   : > { %v1599_v50 = vpop.eup %1598 }
 0xcec   : > { %1272 = vrot.lane.b32.xlu0 %v1599_v50, %s1649_s11 }
 0xced   : > { %v1601_v52 = vpop.eup %1600 }
 0xcee   : > { %v1267_v53 = vadd.f32 1.0, %v1601_v52 }
 0xcf0   : > { %1602 = vrcp.f32 %v1267_v53 }
 0xcfa   : > { %v1603_v54 = vpop.eup %1602 }
 0xcfb   : > { %v1276_v55 = vsub.f32 1.0, %v1603_v54 }
 0xcfd   : > { %v1277_v58 = vmul.f32 %v1276_v55, %v1131_v25 }
 0xd5e   : > { %v1273_v56 = vpop.permute.xlu0 %1272 }
 0xd5f   : > { %v1275_v57 = vmul.f32 %v1603_v54, %v1273_v56 }
 0xd61   : > { %v1278_v59 = vadd.f32 %v1277_v58, %v1275_v57 }
 0xd63   : > { %1279 = vst.msk [vmem:[#allocation6] sm:$0xff] %vm721_vm8, %v1278_v59 }
 0xd64 PF: > { %p1500_p7 = scmp.eq.s32.totalorder %s1713_s14, 1  ;;  %s1651_s20 = smov [#allocation6]  }
 0xd65   : > { %s1287_s21 = sshll.u32 %s1651_s20, 4  ;;  %s1288_s21 = int_to_ptr.vmem [resolvable:$true] %s1287_s21 }
 0xd66   : > { %s1604_s22 = scalar_lea.vmem %s1288_s21, 128  ;;  %p1611_p11 = scmp.lt.s32.totalorder %s1288_s21, %s1288_s21 }
 0xd67   : > { %p1605_p8 = scmp.ne.s32.totalorder %s1288_s21, %s1604_s22  ;;  %p1612_p12 = scmp.lt.s32.totalorder %s1604_s22, %s1604_s22 }
 0xd69   : > { %p1606_p9 = pnand %p1605_p8, %p1500_p7  ;;  %p1613_p13 = por %p1612_p12, %p1611_p11 }
 0xd6b   : > { %p1607_p10 = pneg %p1606_p9 }
 0xd6d   : > { %p1614_p0 = pnand %p1613_p13, %p1607_p10 }
 0xd6f   : > { %1617 = shalt.err (!%p1614_p0)
}
 0xd70   : > { %s1618_s25 = scalar_lea.hbm %s1963_s10, 128 }
 0xd71   : > { %p1619_p1 = scmp.ne.s32.totalorder %s1963_s10, %s1618_s25  ;;  %p1624_p4 = scmp.lt.u32.totalorder %s1618_s25, %s1963_s10 }
 0xd73   : > { %p1620_p2 = pnand %p1619_p1, %p1500_p7 }
 0xd75   : > { %p1621_p3 = pneg %p1620_p2 }
 0xd77   : > { %p1626_p5 = pnand %p1624_p4, %p1621_p3 }
 0xd79   : > { %1629 = shalt.err (!%p1626_p5)
}
 0xd7a   : > { %1497 = dma.vmem_to_hbm [thread:$0]  (%p1500_p7), %s1288_s21, 128, %s1963_s10, [#allocation7]  }
 0xd7b   : > { %1635 = dma.done.wait (%p1500_p7), [#allocation7], 128  }
 0xd7c   : > { %1637 = vsyncadd (%p1500_p7), [#allocation7], 4294967168 }
 0xd7d PF: > { %s21_s13 = sadd.s32 1, %s1640_s13  }
 0xd7e   : > { %p18_p6 = scmp.ge.s32.totalorder %s21_s13, 4  }
 0xd80   :  { %20 = sbr.rel (!%p18_p6) target bundleno = 1 (0x1), region = 104 }
 0xd87   :  { %1300 = vsyncpa [#allocation7], 1 }
 0xd88   :  { %1302 = vsyncpa [#allocation7 + $0x1], 1 }

</bundles_post_ra>
